<compile_context>
chip_gen: v6e
topology: v6e:2x2x1
jax: 0.10.0
libtpu: 0.0.40
codegen_flags: <defaults>
</compile_context>

<pallas_src>
import math
from functools import partial

import jax
import jax.numpy as jnp
from jax.experimental import pallas as pl
from jax.experimental.pallas import tpu as pltpu

_LANE = 128
# Leave headroom under the 32 MiB default scoped-VMEM limit (and well under
# v7x's 64 MiB physical VMEM) for double-buffered pipeline buffers.
_VMEM_BUDGET_BYTES = 24 * 1024 * 1024


def _round_up(x, m):
    return ((x + m - 1) // m) * m


def _sublane(itemsize):
    # Second-minor tile granularity depends on dtype packing:
    # 8 rows for 32-bit, 16 for 16-bit, 32 for 8-bit dtypes.
    return max(8, 32 // itemsize)


# ---------------------------------------------------------------------------
# Kernels
# ---------------------------------------------------------------------------
def _linear_single_k_kernel(x_ref, w_ref, b_ref, o_ref):
    # Fast path: the whole reduction is one step -> no accumulator RMW, and the
    # weight block is grid-invariant (DMA'd from HBM exactly once).
    acc = jnp.dot(x_ref[...], w_ref[...], preferred_element_type=jnp.float32)
    o_ref[...] = (acc + b_ref[...].astype(jnp.float32)).astype(o_ref.dtype)


def _linear_multi_k_kernel(x_ref, w_ref, b_ref, o_ref, acc_ref):
    # x_ref: (tm, tk)  w_ref: (tk, c_pad)  b_ref: (1, c_pad)  o_ref: (tm, c_pad)
    k = pl.program_id(1)

    @pl.when(k == 0)
    def _():
        # Fold the bias into the accumulator init (removes the extra VPU add
        # and branch work on the final K step).
        acc_ref[...] = jnp.broadcast_to(
            b_ref[...].astype(jnp.float32), acc_ref.shape
        )

    acc_ref[...] += jnp.dot(
        x_ref[...], w_ref[...], preferred_element_type=jnp.float32
    )

    @pl.when(k == pl.num_programs(1) - 1)
    def _():
        o_ref[...] = acc_ref[...].astype(o_ref.dtype)


# ---------------------------------------------------------------------------
# Parameter prep (one-time, outside the per-forward path)
# ---------------------------------------------------------------------------
def prepare_params(weight, bias, dtype=None):
    """Transpose nn.Linear's [num_classes, in_dim] weight to [in_dim, num_classes]
    and zero-pad the class axis to a multiple of 128 (lane-dense output ->
    unmasked stores, full MXU columns).  Optionally cast to `dtype`
    (e.g. jnp.bfloat16) to halve HBM parameter traffic; accumulation stays f32.
    """
    if dtype is not None:
        weight = weight.astype(dtype)
        bias = bias.astype(dtype)
    num_classes, in_dim = weight.shape
    c_pad = _round_up(num_classes, _LANE)
    w_t = weight.T  # [in_dim, num_classes]
    w_t_pad = jnp.zeros((in_dim, c_pad), weight.dtype).at[:, :num_classes].set(w_t)
    b_pad = jnp.zeros((1, c_pad), bias.dtype).at[0, :num_classes].set(bias)
    return w_t_pad, b_pad, num_classes


# ---------------------------------------------------------------------------
# Tile selection
# ---------------------------------------------------------------------------
def _choose_tiles(n_rows, in_dim, c_pad, itemsize):
    """Returns (tm, tk). tk == in_dim selects the single-K fast path."""
    sub = _sublane(itemsize)

    def m_tile(cap):
        if n_rows <= 256:
            return _round_up(max(n_rows, sub), sub)
        # Keep >= 2 M blocks so both v7x TensorCores get work on the
        # "parallel" M axis; costs nothing on v5e/v6e (single TC).
        return min(cap, _round_up(pl.cdiv(n_rows, 2), sub))

    def single_k_fits(tm):
        x_tile = tm * in_dim * itemsize * 2          # double-buffered
        w_tile = in_dim * c_pad * itemsize * 2
        o_tile = tm * c_pad * itemsize * 2
        return x_tile + w_tile + o_tile <= _VMEM_BUDGET_BYTES

    # Prefer the single-K fast path with the largest M tile that fits:
    # this kernel is HBM-bandwidth-bound, so big tiles + a single weight DMA win.
    for cap in (1024, 512, 256):
        tm = m_tile(cap)
        if single_k_fits(tm):
            return tm, in_dim

    # Fallback for very large in_dim: multi-K reduction with an f32 accumulator.
    tm = m_tile(512)
    tk = 512
    for cand in (2048, 1024, 512, 256, 128):
        if in_dim % cand == 0:
            tk = cand            # avoid a wrapper-side K pad when possible
            break
    return tm, tk


# ---------------------------------------------------------------------------
# Forward pass
# ---------------------------------------------------------------------------
@partial(jax.jit, static_argnames=("num_classes",))
def graph_classifier_forward(x, w_t_pad, b_pad, num_classes):
    """y = x @ W.T + b with pre-transposed, lane-padded parameters.

    x:        [N, in_dim]
    w_t_pad:  [in_dim, c_pad]   (c_pad = round_up(num_classes, 128))
    b_pad:    [1, c_pad]
    returns   [N, num_classes]
    """
    n, in_dim = x.shape
    k_dim, c_pad = w_t_pad.shape
    assert k_dim == in_dim
    assert x.dtype == w_t_pad.dtype, "keep x and weights in the same dtype"

    itemsize = jnp.dtype(x.dtype).itemsize
    w_itemsize = jnp.dtype(w_t_pad.dtype).itemsize
    b_itemsize = jnp.dtype(b_pad.dtype).itemsize

    tm, tk = _choose_tiles(n, in_dim, c_pad, itemsize)
    grid_m = pl.cdiv(n, tm)   # ragged last M block handled by Pallas (no x pad)

    if tk == in_dim:
        # ---- single-K fast path: grid-invariant weight, no accumulator ----
        cost = pl.CostEstimate(
            flops=2 * n * in_dim * c_pad,
            transcendentals=0,
            bytes_accessed=(n * in_dim * itemsize          # x read
                            + in_dim * c_pad * w_itemsize  # weight (read once)
                            + c_pad * b_itemsize           # bias
                            + n * c_pad * itemsize),       # output write
        )
        out = pl.pallas_call(
            _linear_single_k_kernel,
            out_shape=jax.ShapeDtypeStruct((n, c_pad), x.dtype),
            grid_spec=pltpu.PrefetchScalarGridSpec(
                num_scalar_prefetch=0,
                grid=(grid_m,),
                in_specs=[
                    pl.BlockSpec((tm, in_dim), lambda i: (i, 0)),      # x tile
                    pl.BlockSpec((in_dim, c_pad), lambda i: (0, 0)),   # weight (invariant)
                    pl.BlockSpec((1, c_pad), lambda i: (0, 0)),        # bias (invariant)
                ],
                out_specs=pl.BlockSpec((tm, c_pad), lambda i: (i, 0)),
            ),
            compiler_params=pltpu.CompilerParams(
                dimension_semantics=("parallel",),
            ),
            cost_estimate=cost,
        )(x, w_t_pad, b_pad)
    else:
        # ---- multi-K reduction path (very large in_dim) ----
        k_pad = _round_up(in_dim, tk)
        # K must stay zero-padded for correctness (garbage K would corrupt
        # real outputs); only applied when tk doesn't divide in_dim.
        x_use = x if k_pad == in_dim else jnp.pad(x, ((0, 0), (0, k_pad - in_dim)))
        w_use = (w_t_pad if k_pad == in_dim
                 else jnp.pad(w_t_pad, ((0, k_pad - in_dim), (0, 0))))
        grid = (grid_m, k_pad // tk)
        cost = pl.CostEstimate(
            flops=2 * n * k_pad * c_pad,
            transcendentals=0,
            bytes_accessed=(n * k_pad * itemsize
                            + grid_m * k_pad * c_pad * w_itemsize  # weight per M block
                            + c_pad * b_itemsize
                            + n * c_pad * itemsize),
        )
        out = pl.pallas_call(
            _linear_multi_k_kernel,
            out_shape=jax.ShapeDtypeStruct((n, c_pad), x.dtype),
            grid_spec=pltpu.PrefetchScalarGridSpec(
                num_scalar_prefetch=0,
                grid=grid,
                in_specs=[
                    pl.BlockSpec((tm, tk), lambda i, k: (i, k)),       # x tile
                    pl.BlockSpec((tk, c_pad), lambda i, k: (k, 0)),    # weight tile
                    pl.BlockSpec((1, c_pad), lambda i, k: (0, 0)),     # bias (invariant)
                ],
                out_specs=pl.BlockSpec((tm, c_pad), lambda i, k: (i, 0)),
                scratch_shapes=[pltpu.VMEM((tm, c_pad), jnp.float32)],
            ),
            compiler_params=pltpu.CompilerParams(
                dimension_semantics=("parallel", "arbitrary"),
            ),
            cost_estimate=cost,
        )(x_use, w_use, b_pad)

    # Output rows are exact (no M padding); only the lane-padded class axis may
    # need slicing.  Consumers that accept the padded slab can skip this.
    return out if c_pad == num_classes else out[:, :num_classes]


def graph_classifier_apply(x, w_t_pad, b_pad, num_classes, *, min_rows_for_pallas=0):
    """Dispatcher: for tiny standalone heads, a plain XLA dot beats the fixed
    pallas_call/DMA overhead.  # TODO(synk): fuse into the upstream
    pooling/readout kernel for real workloads."""
    if x.shape[0] < min_rows_for_pallas:
        return x @ w_t_pad[:, :num_classes] + b_pad[0, :num_classes].astype(x.dtype)
    return graph_classifier_forward(x, w_t_pad, b_pad, num_classes)


def init_params(key, in_dim, num_classes):
    """Deterministic init mirroring nn.Linear.reset_parameters
    (Kaiming-uniform weight, uniform(+-1/sqrt(fan_in)) bias)."""
    k_w, k_b = jax.random.split(key)
    bound = 1.0 / math.sqrt(in_dim)
    weight = jax.random.uniform(
        k_w, (num_classes, in_dim), jnp.float32, -bound, bound
    )
    bias = jax.random.uniform(k_b, (num_classes,), jnp.float32, -bound, bound)
    return weight, bias


if __name__ == "__main__":
    key = jax.random.PRNGKey(0)
    k_x, k_p, k_x2 = jax.random.split(key, 3)

    # Small shapes consistent with the module: 8 graph embeddings,
    # in_dim=32 features, num_classes=8.
    N, IN_DIM, NUM_CLASSES = 8, 32, 8

    x = jax.random.normal(k_x, (N, IN_DIM), dtype=jnp.float32)
    weight, bias = init_params(k_p, IN_DIM, NUM_CLASSES)

    # One-time parameter prep: transpose + lane-pad the class axis.
    w_t_pad, b_pad, n_classes = prepare_params(weight, bias)

    y = graph_classifier_forward(x, w_t_pad, b_pad, n_classes)
    jax.block_until_ready(y)
    y_ref = x @ weight.T + bias
    assert y.shape == (N, NUM_CLASSES)
    assert jnp.allclose(y, y_ref, atol=1e-5, rtol=1e-5)

    # Second check: ragged M (no wrapper-side x pad) with >= 2 M blocks.
    N2 = 300
    x2 = jax.random.normal(k_x2, (N2, IN_DIM), dtype=jnp.float32)
    y2 = graph_classifier_forward(x2, w_t_pad, b_pad, n_classes)
    jax.block_until_ready(y2)
    y2_ref = x2 @ weight.T + bias
    assert y2.shape == (N2, NUM_CLASSES)
    assert jnp.allclose(y2, y2_ref, atol=1e-4, rtol=1e-4)

    print("KERNEL_OK")
</pallas_src>

<mosaic_0001>
module attributes {stable_mosaic.version = 11 : i64} {
  func.func @_linear_single_k_kernel(%arg0: i32, %arg1: memref<8x32xf32, #tpu.memory_space<vmem>>, %arg2: memref<32x128xf32, #tpu.memory_space<vmem>>, %arg3: memref<1x128xf32, #tpu.memory_space<vmem>>, %arg4: memref<8x128xf32, #tpu.memory_space<vmem>>) attributes {dimension_semantics = [#tpu.dimension_semantics<parallel>], iteration_bounds = array<i64: 1>, scalar_prefetch = 0 : i64, scratch_operands = 0 : i64, tpu.core_type = #tpu.core_type<tc>, window_params = [{transform_indices = @transform_0, window_bounds = array<i64: 8, 32>}, {pipeline_mode = #tpu.pipeline_mode<synchronous>, transform_indices = @transform_1, window_bounds = array<i64: 32, 128>}, {pipeline_mode = #tpu.pipeline_mode<synchronous>, transform_indices = @transform_2, window_bounds = array<i64: 1, 128>}, {transform_indices = @transform_3, window_bounds = array<i64: 8, 128>}]} {
    %c0 = arith.constant 0 : index
    %c0_0 = arith.constant 0 : index
    %0 = vector.load %arg1[%c0, %c0_0] : memref<8x32xf32, #tpu.memory_space<vmem>>, vector<8x32xf32>
    %c0_1 = arith.constant 0 : index
    %c0_2 = arith.constant 0 : index
    %1 = vector.load %arg2[%c0_1, %c0_2] : memref<32x128xf32, #tpu.memory_space<vmem>>, vector<32x128xf32>
    %cst = arith.constant dense<0.000000e+00> : vector<8x128xf32>
    %2 = tpu.matmul %0, %1, %cst {dimension_numbers = #tpu.dot_dimension_numbers<[1], [0], [0], [1], [0, 0, 1, 1], [], []>} : vector<8x32xf32>, vector<32x128xf32>, vector<8x128xf32> -> vector<8x128xf32>
    %c0_3 = arith.constant 0 : index
    %c0_4 = arith.constant 0 : index
    %3 = vector.load %arg3[%c0_3, %c0_4] : memref<1x128xf32, #tpu.memory_space<vmem>>, vector<1x128xf32>
    %4 = vector.broadcast %3 : vector<1x128xf32> to vector<8x128xf32>
    %5 = arith.addf %2, %4 : vector<8x128xf32>
    %c0_5 = arith.constant 0 : index
    %c0_6 = arith.constant 0 : index
    %6 = vector.load %arg4[%c0_5, %c0_6] : memref<8x128xf32, #tpu.memory_space<vmem>>, vector<8x128xf32>
    tpu.vector_store %arg4[%c0_5, %c0_6], %5 {strides = array<i32>} : memref<8x128xf32, #tpu.memory_space<vmem>>, vector<8x128xf32>,
    return
  }
  func.func @transform_0(%arg0: i32) -> (i32, i32) {
    %c0_i32 = arith.constant 0 : i32
    %c0_i32_0 = arith.constant 0 : i32
    return %arg0, %c0_i32 : i32, i32
  }
  func.func @transform_1(%arg0: i32) -> (i32, i32) {
    %c0_i32 = arith.constant 0 : i32
    %c0_i32_0 = arith.constant 0 : i32
    %c0_i32_1 = arith.constant 0 : i32
    return %c0_i32, %c0_i32_0 : i32, i32
  }
  func.func @transform_2(%arg0: i32) -> (i32, i32) {
    %c0_i32 = arith.constant 0 : i32
    %c0_i32_0 = arith.constant 0 : i32
    %c0_i32_1 = arith.constant 0 : i32
    return %c0_i32, %c0_i32_0 : i32, i32
  }
  func.func @transform_3(%arg0: i32) -> (i32, i32) {
    %c0_i32 = arith.constant 0 : i32
    %c0_i32_0 = arith.constant 0 : i32
    return %arg0, %c0_i32 : i32, i32
  }
}

</mosaic_0001>

<bundles_post_ra>
// kernel: graph_classifier_forward.1
= control target key start
LH: loop header
LB: loop body
LE: loop exit
PB: predicated region body
PF: predicated region fallthrough
CT: control target
= control target key end

     0   :  { %8 = vsyncpa [#allocation3], 0  ;;  %s274_s0 = inlined_call_operand.hbm [shape: f32[8,32], index: 0, kind: input, shape index: {}]   ;;  %s275_s1 = inlined_call_operand.hbm [shape: f32[32,128], index: 1, kind: input, shape index: {}]   ;;  %s276_s2 = inlined_call_operand.vmem [shape: f32[1,128], index: 2, kind: input, shape index: {}]   ;;  %s277_s3 = inlined_call_operand.hbm [shape: f32[8,128], index: 3, kind: output, shape index: {}]  }
   0x1   :  { %9 = vsyncpa [#allocation6], 0 }
   0x2   :  { %10 = vsyncpa [#allocation4], 0  ;;  %s235_s12 = smov [#allocation2]   ;;  %s236_s14 = smov [#allocation5]  }
   0x3   :  { %s17_s13 = sshll.u32 %s235_s12, 4  ;;  %s26_s15 = sshll.u32 %s236_s14, 4  ;;  %s18_s13 = int_to_ptr.vmem [resolvable:$true] %s17_s13  ;;  %s27_s15 = int_to_ptr.vmem [resolvable:$true] %s26_s15 }
   0x4   :  { %s177_s16 = scalar_lea.vmem %s18_s13, 128  ;;  %p182_p1 = scmp.lt.s32.totalorder %s18_s13, %s18_s13 }
   0x5   :  { %p178_p0 = scmp.ne.s32.totalorder %s18_s13, %s177_s16  ;;  %p183_p2 = scmp.lt.s32.totalorder %s177_s16, %s177_s16 }
   0x7   :  { %p184_p3 = por %p183_p2, %p182_p1 }
   0x9   :  { %p185_p4 = pnand %p184_p3, %p178_p0 }
   0xb   :  { %188 = shalt.err (!%p185_p4)
}
   0xc   :  { %20 = dma.hbm_to_vmem [thread:$0]  %s274_s0, 128, %s18_s13, [#allocation3]  }
   0xd   :  { %s197_s19 = scalar_lea.vmem %s27_s15, 512  ;;  %p202_p6 = scmp.lt.s32.totalorder %s27_s15, %s27_s15 }
   0xe   :  { %p198_p5 = scmp.ne.s32.totalorder %s27_s15, %s197_s19  ;;  %p203_p7 = scmp.lt.s32.totalorder %s197_s19, %s197_s19 }
  0x10   :  { %p204_p8 = por %p203_p7, %p202_p6 }
  0x12   :  { %p205_p9 = pnand %p204_p8, %p198_p5 }
  0x14   :  { %208 = shalt.err (!%p205_p9)
}
  0x15   :  { %s237_s20 = smov 128   ;;  %s238_s21 = smov 8  }
  0x16   :  { %32 = dma.hbm_to_vmem [thread:$0]  %s275_s1, 512, %s27_s15, [#allocation6], %s237_s20, %s237_s20, %s238_s21  }
  0x17   :  { %229 = dma.done.wait [#allocation3], 128  }
  0x18   :  { %230 = vsyncadd [#allocation3], 4294967168 }
  0x19   :  { %231 = dma.done.wait [#allocation6], 512  }
  0x1a   :  { %232 = vsyncadd [#allocation6], 4294966784  ;;  %v239_v0 = vmov 0.0   ;;  %vm240_vm0 = vmmov 0   ;;  %v45_v1 = vld [vmem:[#allocation5 + $0x18] sm:$0xff]  ;;  %v44_v2 = vld [vmem:[#allocation5 + $0x10] sm:$0xff] }
  0x1b   :  { %151 = vmatprep.subr.mxu0 %v239_v0  ;;  %159 = vmatprep.mubr.msk.f32.mxu0 %vm240_vm0, %v239_v0  ;;  %v43_v3 = vld [vmem:[#allocation5 + $0x8] sm:$0xff]  ;;  %v42_v4 = vld [vmem:[#allocation5] sm:$0xff]  ;;  %v41_v5 = vld [vmem:[#allocation2] sm:$0xff]  ;;  %vm53_vm1 = vcmask 261120   ;;  %s241_s24 = smov [#allocation7]  }
  0x1c   :  { %152 = vmatpush3.msra.mxu0 %v45_v1  ;;  %v144_v6 = vld [vmem:[%s276_s2] ss:$0 sm:$0xff]  ;;  %s134_s25 = sshll.u32 %s241_s24, 4  ;;  %s135_s25 = int_to_ptr.vmem [resolvable:$true] %s134_s25 }
  0x1d   :  { %153 = vmatprep.subr.mxu0 %v239_v0  ;;  %s209_s26 = scalar_lea.vmem %s135_s25, 128  ;;  %p214_p11 = scmp.lt.s32.totalorder %s135_s25, %s135_s25 }
  0x1e   :  { %154 = vmatpush3.msra.mxu0 %v44_v2  ;;  %p210_p10 = scmp.ne.s32.totalorder %s135_s25, %s209_s26  ;;  %p215_p12 = scmp.lt.s32.totalorder %s209_s26, %s209_s26 }
  0x1f   :  { %155 = vmatprep.subr.mxu0 %v239_v0 }
  0x20   :  { %156 = vmatpush3.msra.mxu0 %v43_v3  ;;  %p216_p13 = por %p215_p12, %p214_p11 }
  0x21   :  { %157 = vmatprep.subr.mxu0 %v239_v0 }
  0x22   :  { %158 = vmatpush3.msra.mxu0 %v42_v4  ;;  %p217_p0 = pnand %p216_p13, %p210_p10 }
  0x23   :  { %160 = vmatmul.mubr.msk.f32.vlgmr.msra.gmra.mxu0 %vm53_vm1, %v41_v5 }
  0xe3   :  { %v123_v7 = vpop.f32.mrf.mxu0 }
  0xe4   :  { %v124_v8 = vadd.f32 %v144_v6, %v123_v7 }
  0xe5   :  { %v161_v9 = vpop.f32.mrf.mxu0 }
  0xe6   :  { %127 = vst [vmem:[#allocation7] sm:$0xff] %v124_v8 }
  0xe7   :  { %220 = shalt.err (!%p217_p0)
}
  0xe8   :  { %137 = dma.vmem_to_hbm [thread:$0]  %s135_s25, 128, %s277_s3, [#allocation4]  }
  0xe9   :  { %233 = dma.done.wait [#allocation4], 128  }
  0xea   :  { %234 = vsyncadd [#allocation4], 4294967168 }
  0xeb   :  { %141 = vsyncpa [#allocation3], 1 }
  0xec   :  { %142 = vsyncpa [#allocation6], 1 }
  0xed   :  { %143 = vsyncpa [#allocation4], 1 }

</bundles_post_ra>
